<compile_context>
chip_gen: v7x
topology: tpu7x:2x2x1
jax: 0.10.0
libtpu: 0.0.40
codegen_flags: <defaults>
</compile_context>

<pallas_src>
import functools

import jax
import jax.numpy as jnp
from jax import lax
from jax.experimental import pallas as pl
from jax.experimental.pallas import tpu as pltpu


_NEG_INF = -1e30  # large finite negative; diagonal is never masked so softmax is safe


def _attn_kernel(x_ref, wqkv_ref, o_ref, *, scale, n_heads, mxu_dtype):
    """One grid step: a (Bblk, T, C) slab of x against the fused QKV weight.

    wqkv_ref is (C, 3*F) laid out [Wq | Wk | Wv] with F = n_heads * head_size.
    Output is (Bblk, T, F): per-head attention outputs concatenated along the
    last dim (identical to running n_heads independent `Head` modules).
    """
    bblk, T, C = x_ref.shape
    f3 = wqkv_ref.shape[1]
    F = f3 // 3
    H = F // n_heads

    x = x_ref[...]          # already narrow (e.g. bf16) if the wrapper requested it
    w = wqkv_ref[...]

    # Fused QKV projection: one MXU pass, M = Bblk*T, N = 3F. Flatten only when
    # it is a free relayout (T % 8 == 0); otherwise per-batch 2-D dots.
    if T % 8 == 0:
        qkv = jnp.dot(x.reshape(bblk * T, C), w,
                      preferred_element_type=jnp.float32).reshape(bblk, T, f3)
    else:
        qkv = jnp.stack(
            [jnp.dot(x[b], w, preferred_element_type=jnp.float32)
             for b in range(bblk)], axis=0)

    # Causal (lower-triangular) mask, shared by all heads.
    row = lax.broadcasted_iota(jnp.int32, (T, T), 0)
    col = lax.broadcasted_iota(jnp.int32, (T, T), 1)
    causal = (col <= row)[None, :, :]

    outs = []
    for h in range(n_heads):                       # static unroll over heads
        # Fold the C**-0.5 scale into q (T*H elements, not the (T,T) scores).
        q = qkv[:, :, h * H:(h + 1) * H] * scale
        k = qkv[:, :, F + h * H:F + (h + 1) * H]
        v = qkv[:, :, 2 * F + h * H:2 * F + (h + 1) * H]
        if mxu_dtype is not None:                  # narrow MXU operands, f32 acc
            q = q.astype(mxu_dtype)
            k = k.astype(mxu_dtype)
            v = v.astype(mxu_dtype)

        # Scores: contract the trailing H dim directly (no k.T relayout).
        s = jnp.einsum("btd,bsd->bts", q, k,
                       preferred_element_type=jnp.float32)        # (Bblk, T, T)
        s = jnp.where(causal, s, _NEG_INF)

        # Numerically stable softmax; reciprocal uses the otherwise-idle EUP.
        s = s - jnp.max(s, axis=-1, keepdims=True)
        p = jnp.exp(s)
        p = p * pl.reciprocal(jnp.sum(p, axis=-1, keepdims=True), approx=True)

        # TODO(synk): attention-weight dropout omitted (eval mode => identity).

        if mxu_dtype is not None:
            p = p.astype(mxu_dtype)
        outs.append(jnp.einsum("bts,bsd->btd", p, v,
                               preferred_element_type=jnp.float32))

    out = outs[0] if n_heads == 1 else jnp.concatenate(outs, axis=-1)
    o_ref[...] = out.astype(o_ref.dtype)

    # TODO(synk): for T >= ~512 replace the materialized (Bblk, T, T) scores
    # with a kv-tiled (flash-style) online softmax grid axis to fit v7x VMEM.


def _pick_block_b(B, target):
    # Keep >= 2 grid steps when B >= 2 so both v7x TensorCores get work under
    # dimension_semantics=("parallel",); harmless on single-TC v5e/v6e.
    cap = B // 2 if B >= 2 else 1
    bblk = max(1, min(B, target, cap))
    while B % bblk:
        bblk -= 1
    return bblk


def _vmem_limit_bytes(bblk, T, C, F, in_itemsize, out_itemsize):
    """Per-step footprint (double-buffered I/O + f32 temporaries) + headroom."""
    f3 = 3 * F
    bufs = (2 * bblk * T * C * in_itemsize        # x block (double buffered)
            + 2 * C * f3 * in_itemsize            # fused QKV weight
            + 2 * bblk * T * F * out_itemsize)    # output block
    tmps = (bblk * T * f3 * 4                     # qkv (f32 accumulation)
            + 2 * bblk * T * T * 4                # scores + exp
            + bblk * T * F * 4)                   # pre-store output
    est = int(1.5 * (bufs + tmps))
    return max(min(est, 64 * 1024 * 1024), 4 * 1024 * 1024)


def _attention_call(x, wqkv, n_heads, scale, out_dtype, block_b, mxu_dtype):
    B, T, C = x.shape
    f3 = wqkv.shape[1]
    F = f3 // 3
    bblk = _pick_block_b(B, block_b)

    kernel = functools.partial(_attn_kernel, scale=scale, n_heads=n_heads,
                               mxu_dtype=mxu_dtype)

    return pl.pallas_call(
        kernel,
        out_shape=jax.ShapeDtypeStruct((B, T, F), out_dtype),
        grid_spec=pltpu.PrefetchScalarGridSpec(
            num_scalar_prefetch=0,
            grid=(B // bblk,),
            in_specs=[
                pl.BlockSpec((bblk, T, C), lambda b: (b, 0, 0)),
                # Grid-invariant weight block (0, 0) -> stays VMEM-resident.
                pl.BlockSpec((C, f3), lambda b: (0, 0)),
            ],
            out_specs=pl.BlockSpec((bblk, T, F), lambda b: (b, 0, 0)),
        ),
        compiler_params=pltpu.CompilerParams(
            dimension_semantics=("parallel",),
            vmem_limit_bytes=_vmem_limit_bytes(
                bblk, T, C, F, x.dtype.itemsize, jnp.dtype(out_dtype).itemsize),
        ),
    )(x, wqkv)


def head_forward(x, w_key, w_query, w_value, *, block_b=8, mxu_dtype=None):
    """Single `Head` forward. x: (B, T, C); w_*: PyTorch-Linear weights (H, C).

    mxu_dtype: optional narrow dtype (e.g. jnp.bfloat16). Casting is done here
    in the wrapper so x/weights enter the kernel narrow (halved HBM traffic);
    all matmuls still accumulate in f32. Beneficial on v5e, v6e and v7x.
    """
    B, T, C = x.shape
    scale = float(C) ** -0.5
    out_dtype = x.dtype
    wqkv = jnp.concatenate(
        [jnp.asarray(w_query).T, jnp.asarray(w_key).T, jnp.asarray(w_value).T],
        axis=1)                                                  # (C, 3H)
    if mxu_dtype is not None:
        x = x.astype(mxu_dtype)
        wqkv = wqkv.astype(mxu_dtype)
    return _attention_call(x, wqkv, 1, scale, out_dtype, block_b, mxu_dtype)


def fused_heads_forward(x, w_keys, w_queries, w_values, *, block_b=8,
                        mxu_dtype=None):
    """n_heads independent `Head`s fused into one kernel.

    w_*: (n_heads, H, C). Output (B, T, n_heads*H) equals the per-head Head
    outputs concatenated along the last dim. With n_heads*H >= 128 the output
    store is lane-dense and x is loaded once for all heads.
    """
    B, T, C = x.shape
    n_heads, H, _ = w_keys.shape
    scale = float(C) ** -0.5
    out_dtype = x.dtype

    def fuse(w):  # (nH, H, C) -> (C, nH*H); column h*H+d = head h, out-dim d
        return jnp.transpose(jnp.asarray(w), (2, 0, 1)).reshape(C, n_heads * H)

    wqkv = jnp.concatenate([fuse(w_queries), fuse(w_keys), fuse(w_values)],
                           axis=1)                               # (C, 3*nH*H)
    if mxu_dtype is not None:
        x = x.astype(mxu_dtype)
        wqkv = wqkv.astype(mxu_dtype)
    return _attention_call(x, wqkv, n_heads, scale, out_dtype, block_b,
                           mxu_dtype)


def head_forward_ref(x, w_key, w_query, w_value):
    """Pure-JAX reference matching the PyTorch module."""
    B, T, C = x.shape
    k = x @ w_key.T
    q = x @ w_query.T
    v = x @ w_value.T
    wei = (q @ jnp.swapaxes(k, -2, -1)) * (float(C) ** -0.5)
    mask = jnp.tril(jnp.ones((T, T), dtype=bool))
    wei = jnp.where(mask, wei, -jnp.inf)
    wei = jax.nn.softmax(wei, axis=-1)
    return wei @ v


if __name__ == "__main__":
    # Small, module-consistent shapes.
    B, T = 2, 8                 # batch, sequence length (<= block_size)
    n_embd = 32                 # C
    head_size = 16              # H
    dropout = 0.0               # eval-mode / identity

    key = jax.random.PRNGKey(0)
    kx, kk, kq, kv, kmh = jax.random.split(key, 5)

    x = jax.random.normal(kx, (B, T, n_embd), dtype=jnp.float32)
    w_key = jax.random.normal(kk, (head_size, n_embd), dtype=jnp.float32) * 0.02
    w_query = jax.random.normal(kq, (head_size, n_embd), dtype=jnp.float32) * 0.02
    w_value = jax.random.normal(kv, (head_size, n_embd), dtype=jnp.float32) * 0.02

    ref = head_forward_ref(x, w_key, w_query, w_value)

    # 1) Single head, f32 (module-exact path).
    out = jax.block_until_ready(head_forward(x, w_key, w_query, w_value))
    assert out.shape == (B, T, head_size)
    assert jnp.allclose(out, ref, atol=1e-3, rtol=1e-3), "mismatch (single head, f32)"

    # 2) Single head, bf16 operands shipped from the wrapper; f32 accumulation.
    out_bf16 = jax.block_until_ready(
        head_forward(x, w_key, w_query, w_value, mxu_dtype=jnp.bfloat16))
    assert jnp.allclose(out_bf16, ref, atol=5e-2, rtol=5e-2), \
        "mismatch (single head, bf16)"

    # 3) Fused multi-head: 8 heads x 16 = 128-wide, lane-dense output.
    n_heads = 8
    kq3, kk3, kv3 = jax.random.split(kmh, 3)
    w_keys = jax.random.normal(kk3, (n_heads, head_size, n_embd), jnp.float32) * 0.02
    w_queries = jax.random.normal(kq3, (n_heads, head_size, n_embd), jnp.float32) * 0.02
    w_values = jax.random.normal(kv3, (n_heads, head_size, n_embd), jnp.float32) * 0.02

    fused = jax.block_until_ready(
        fused_heads_forward(x, w_keys, w_queries, w_values))
    ref_fused = jnp.concatenate(
        [head_forward_ref(x, w_keys[h], w_queries[h], w_values[h])
         for h in range(n_heads)], axis=-1)
    assert fused.shape == (B, T, n_heads * head_size)
    assert jnp.allclose(fused, ref_fused, atol=1e-3, rtol=1e-3), \
        "mismatch (fused heads)"

    print("KERNEL_OK")
</pallas_src>

<mosaic_0001>
module attributes {stable_mosaic.version = 11 : i64} {
  func.func @_attn_kernel(%arg0: i32, %arg1: memref<1x8x32xf32, #tpu.memory_space<vmem>>, %arg2: memref<32x48xf32, #tpu.memory_space<vmem>>, %arg3: memref<1x8x16xf32, #tpu.memory_space<vmem>>) attributes {dimension_semantics = [#tpu.dimension_semantics<parallel>], iteration_bounds = array<i64: 2>, scalar_prefetch = 0 : i64, scratch_operands = 0 : i64, tpu.core_type = #tpu.core_type<tc>, window_params = [{transform_indices = @transform_0, window_bounds = array<i64: 1, 8, 32>}, {pipeline_mode = #tpu.pipeline_mode<synchronous>, transform_indices = @transform_1, window_bounds = array<i64: 32, 48>}, {transform_indices = @transform_2, window_bounds = array<i64: 1, 8, 16>}]} {
    %c0 = arith.constant 0 : index
    %c0_0 = arith.constant 0 : index
    %c0_1 = arith.constant 0 : index
    %0 = vector.load %arg1[%c0, %c0_0, %c0_1] : memref<1x8x32xf32, #tpu.memory_space<vmem>>, vector<1x8x32xf32>
    %c0_2 = arith.constant 0 : index
    %c0_3 = arith.constant 0 : index
    %1 = vector.load %arg2[%c0_2, %c0_3] : memref<32x48xf32, #tpu.memory_space<vmem>>, vector<32x48xf32>
    %2 = vector.shape_cast %0 : vector<1x8x32xf32> to vector<8x32xf32>
    %cst = arith.constant dense<0.000000e+00> : vector<8x48xf32>
    %3 = tpu.matmul %2, %1, %cst {dimension_numbers = #tpu.dot_dimension_numbers<[1], [0], [0], [1], [0, 0, 1, 1], [], []>} : vector<8x32xf32>, vector<32x48xf32>, vector<8x48xf32> -> vector<8x48xf32>
    %4 = vector.shape_cast %3 : vector<8x48xf32> to vector<1x8x48xf32>
    %5 = tpu.iota {dimensions = array<i32: 0>} : vector<8x8xi32>
    %6 = tpu.iota {dimensions = array<i32: 1>} : vector<8x8xi32>
    %7 = arith.cmpi sle, %6, %5 : vector<8x8xi32>
    %8 = vector.shape_cast %7 : vector<8x8xi1> to vector<1x8x8xi1>
    %9 = vector.extract_strided_slice %4 {offsets = [0, 0, 0], sizes = [1, 8, 16], strides = [1, 1, 1]} : vector<1x8x48xf32> to vector<1x8x16xf32>
    %cst_4 = arith.constant 0.176776692 : f32
    %10 = vector.broadcast %cst_4 : f32 to vector<1x8x16xf32>
    %11 = arith.mulf %9, %10 : vector<1x8x16xf32>
    %12 = vector.extract_strided_slice %4 {offsets = [0, 0, 16], sizes = [1, 8, 16], strides = [1, 1, 1]} : vector<1x8x48xf32> to vector<1x8x16xf32>
    %13 = vector.extract_strided_slice %4 {offsets = [0, 0, 32], sizes = [1, 8, 16], strides = [1, 1, 1]} : vector<1x8x48xf32> to vector<1x8x16xf32>
    "tpu.trace_start"() <{level = 10 : i32, message = "btd,bsd->bts"}> : () -> ()
    %cst_5 = arith.constant dense<0.000000e+00> : vector<1x8x8xf32>
    %14 = tpu.matmul %11, %12, %cst_5 {dimension_numbers = #tpu.dot_dimension_numbers<[2], [2], [1], [1], [0, 0, 0, 1, 1, 1], [0], [0]>} : vector<1x8x16xf32>, vector<1x8x16xf32>, vector<1x8x8xf32> -> vector<1x8x8xf32>
    %cst_6 = arith.constant -1.000000e+30 : f32
    "tpu.trace_stop"() : () -> ()
    %15 = vector.broadcast %cst_6 : f32 to vector<1x8x8xf32>
    %16 = arith.select %8, %14, %15 : vector<1x8x8xi1>, vector<1x8x8xf32>
    %cst_7 = arith.constant dense<0xFF800000> : vector<1x8xf32>
    %17 = vector.multi_reduction <maximumf>, %16, %cst_7 [2] : vector<1x8x8xf32> to vector<1x8xf32>
    %18 = vector.shape_cast %17 : vector<1x8xf32> to vector<1x8x1xf32>
    %19 = vector.broadcast %18 : vector<1x8x1xf32> to vector<1x8x8xf32>
    %20 = arith.subf %16, %19 : vector<1x8x8xf32>
    %21 = math.exp %20 : vector<1x8x8xf32>
    %cst_8 = arith.constant dense<0.000000e+00> : vector<1x8xf32>
    %22 = vector.multi_reduction <add>, %21, %cst_8 [2] : vector<1x8x8xf32> to vector<1x8xf32>
    %23 = vector.shape_cast %22 : vector<1x8xf32> to vector<1x8x1xf32>
    %24 = tpu.reciprocal %23 {approx = true} : vector<1x8x1xf32> -> vector<1x8x1xf32>
    %25 = vector.broadcast %24 : vector<1x8x1xf32> to vector<1x8x8xf32>
    %26 = arith.mulf %21, %25 : vector<1x8x8xf32>
    "tpu.trace_start"() <{level = 10 : i32, message = "bts,bsd->btd"}> : () -> ()
    %cst_9 = arith.constant dense<0.000000e+00> : vector<1x8x16xf32>
    %27 = tpu.matmul %26, %13, %cst_9 {dimension_numbers = #tpu.dot_dimension_numbers<[2], [1], [1], [2], [0, 0, 0, 1, 1, 2], [0], [0]>} : vector<1x8x8xf32>, vector<1x8x16xf32>, vector<1x8x16xf32> -> vector<1x8x16xf32>
    "tpu.trace_stop"() : () -> ()
    %c0_10 = arith.constant 0 : index
    %c0_11 = arith.constant 0 : index
    %c0_12 = arith.constant 0 : index
    %28 = vector.load %arg3[%c0_10, %c0_11, %c0_12] : memref<1x8x16xf32, #tpu.memory_space<vmem>>, vector<1x8x16xf32>
    tpu.vector_store %arg3[%c0_10, %c0_11, %c0_12], %27 {strides = array<i32>} : memref<1x8x16xf32, #tpu.memory_space<vmem>>, vector<1x8x16xf32>,
    return
  }
  func.func @transform_0(%arg0: i32) -> (i32, i32, i32) {
    %c0_i32 = arith.constant 0 : i32
    %c0_i32_0 = arith.constant 0 : i32
    %c0_i32_1 = arith.constant 0 : i32
    return %arg0, %c0_i32, %c0_i32_0 : i32, i32, i32
  }
  func.func @transform_1(%arg0: i32) -> (i32, i32) {
    %c0_i32 = arith.constant 0 : i32
    %c0_i32_0 = arith.constant 0 : i32
    %c0_i32_1 = arith.constant 0 : i32
    return %c0_i32, %c0_i32_0 : i32, i32
  }
  func.func @transform_2(%arg0: i32) -> (i32, i32, i32) {
    %c0_i32 = arith.constant 0 : i32
    %c0_i32_0 = arith.constant 0 : i32
    %c0_i32_1 = arith.constant 0 : i32
    return %arg0, %c0_i32, %c0_i32_0 : i32, i32, i32
  }
}

</mosaic_0001>

<bundles_post_ra>
// kernel: tpu_custom_call.1
= control target key start
LH: loop header
LB: loop body
LE: loop exit
PB: predicated region body
PF: predicated region fallthrough
CT: control target
= control target key end

     0   :  { %7 = vsyncpa [#allocation3], 0  ;;  %s1008_s0 = inlined_call_operand.hbm [shape: f32[2,8,32], index: 0, kind: input, shape index: {}]   ;;  %s1009_s1 = inlined_call_operand.hbm [shape: f32[32,48], index: 1, kind: input, shape index: {}]   ;;  %s1010_s2 = inlined_call_operand.hbm [shape: f32[2,8,16], index: 2, kind: output, shape index: {}]  }
   0x1   :  { %9 = vsyncpa [#allocation3 + $0x1], 0 }
   0x2   :  { %10 = vsyncpa [#allocation6], 0 }
   0x3   :  { %11 = vsyncpa [#allocation4], 0 }
   0x4   :  { %13 = vsyncpa [#allocation4 + $0x1], 0  ;;  %s799_s9 = smov 0   ;;  %s801_s10 = smov 0  }
   0x5   :  { %s803_s11 = smov 0   ;;  %s805_s12 = smov 0  }
   0x6 LB: > { %s820_s13 = sadd.s32 4294967295, %s772_s12   ;;  %s522_s14 = sadd.s32 4294967294, %s772_s12   ;;  %s772_s12 = sphi %s805_s12, %s1030_s12   ;;  %s768_s11 = sphi %s803_s11, %s1029_s11   ;;  %s764_s10 = sphi %s801_s10, %s1028_s10   ;;  %s760_s9 = sphi %s799_s9, %s1027_s9  }
   0x7   : > { %p39_p0 = scmp.ne.s32.totalorder %s764_s10, %s760_s9  ;;  %p1011_p1 = scmp.eq.s32.totalorder %s820_s13, 0 }
   0x8   : > { %p90_p3 = scmp.eq.s32.totalorder %s522_s14, 1  ;;  %p523_p5 = scmp.ge.s32.totalorder %s772_s12, 1 }
   0x9   : > { %p829_p4 = por %p1011_p1, %p39_p0  ;;  %p97_p7 = scmp.lt.s32.totalorder %s772_s12, 3 }
   0xa   : > { %p834_p6 = por %p90_p3, %p39_p0  ;;  %s774_s18 = smov [#allocation5]  }
   0xb   : > { %s1014_s15 = scalar_select %p829_p4, 1, 0 }
   0xc   : > { %s1015_s16 = scalar_select %p834_p6, 1, 0 }
   0xd   : > { %p839_p8 = pnand %p523_p5, %p97_p7  ;;  %s109_s19 = sshll.u32 %s774_s18, 4  ;;  %s843_s19 = int_to_ptr.vmem [resolvable:$true] %s109_s19 }
   0xe   : > { %s855_s21 = sadd.s32 1, %s772_s12   ;;  %s26_s22 = sadd.s32 1, %s768_s11 }
   0xf   : > { %s1016_s17 = scalar_select %p839_p8, 1, 0 }
  0x10   : > { %p584_p9 = pneg %p839_p8  ;;  %s23_s23 = ssub.s32 %s772_s12, %s855_s21 }
  0x11   : > { %s644_s26 = scalar_lea.hbm %s1009_s1, 512 }
  0x12   : > { %p850_p11 = pnand %p584_p9, %p1011_p1  ;;  %p645_p12 = scmp.ne.s32.totalorder %s1009_s1, %s644_s26 }
  0x13   : > { %p651_p5 = scmp.lt.u32.totalorder %s644_s26, %s1009_s1 }
  0x14   : > { %p646_p13 = pneg %p850_p11 }
  0x16   : > { %p647_p0 = pnand %p646_p13, %p645_p12 }
  0x18   : > { %p648_p3 = pneg %p647_p0 }
  0x1a   : > { %p653_p7 = pnand %p651_p5, %p648_p3 }
  0x1c   : > { %656 = shalt.err (!%p653_p7)
}
  0x1d   : > { %s657_s3 = scalar_lea.vmem %s843_s19, 512  ;;  %p665_p2 = scmp.lt.s32.totalorder %s843_s19, %s843_s19 }
  0x1e   : > { %p658_p9 = scmp.ne.s32.totalorder %s843_s19, %s657_s3  ;;  %p666_p6 = scmp.lt.s32.totalorder %s657_s3, %s657_s3 }
  0x20   : > { %p660_p10 = pnand %p658_p9, %p646_p13  ;;  %p667_p4 = por %p666_p6, %p665_p2 }
  0x22   : > { %p661_p1 = pneg %p660_p10 }
  0x24   : > { %p668_p8 = pnand %p667_p4, %p661_p1 }
  0x26   : > { %671 = shalt.err (!%p668_p8)
}
  0x27   : > { %s775_s4 = smov 128   ;;  %s776_s5 = smov 8  }
  0x28   : > { %587 = dma.hbm_to_vmem [thread:$0]  (!%p850_p11), %s1009_s1, 512, %s843_s19, [#allocation6], %s775_s4, %s775_s4, %s776_s5  }
  0x29   : > { %p24_p2 = scmp.eq.s32.totalorder %s23_s23, 0  ;;  %p33_p1 = scmp.ne.s32.totalorder %s768_s11, %s764_s10 }
  0x2a   : > { %p34_p4 = scmp.eq.s32.totalorder %s772_s12, 0  ;;  %p597_p6 = scmp.lt.s32.totalorder %s772_s12, 2 }
  0x2b   : > { %s886_s8 = scalar_select %p24_p2, %s768_s11, %s26_s22  }
  0x2c   : > { %p35_p8 = por %p34_p4, %p33_p1  ;;  %p1018_p10 = scmp.eq.s32.totalorder %s820_s13, 1 }
  0x2d   : > { %s123_s18 = sand.u32 1, %s768_s11   ;;  %s527_s24 = sshll.u32 %s772_s12, 7 }
  0x2e   : > { %p890_p12 = por %p1018_p10, %p33_p1  ;;  %s526_s25 = sshll.u32 %s123_s18, 3 }
  0x2f   : > { %s899_s27 = scalar_lea.hbm %s1008_s0, %s527_s24  ;;  %s127_s19 = scalar_lea.vmem [#allocation2], %s526_s25 }
  0x30   : > { %s134_s22 = sshll.u32 %s127_s19, 4  ;;  %p901_p11 = pnand %p597_p6, %p35_p8  ;;  %s905_s22 = int_to_ptr.vmem [resolvable:$true] %s134_s22 }
  0x31   : > { %s124_s28 = scalar_lea.sflag [#allocation3], %s123_s18  ;;  %s672_s29 = scalar_lea.hbm %s899_s27, 128 }
  0x32   : > { %p673_p13 = scmp.ne.s32.totalorder %s899_s27, %s672_s29  ;;  %p674_p0 = pneg %p901_p11 }
  0x33   : > { %s677_s4 = scalar_lea.hbm %s1008_s0, 256  ;;  %p678_p7 = scmp.lt.u32.totalorder %s899_s27, %s1008_s0 }
  0x34   : > { %p675_p3 = pnand %p674_p0, %p673_p13  ;;  %p679_p9 = scmp.lt.u32.totalorder %s677_s4, %s672_s29 }
  0x35   : > { %p681_p1 = scmp.lt.u32.totalorder %s672_s29, %s899_s27 }
  0x36   : > { %p676_p5 = pneg %p675_p3  ;;  %p680_p2 = por %p679_p9, %p678_p7 }
  0x38   : > { %p682_p4 = por %p681_p1, %p680_p2 }
  0x3a   : > { %p683_p6 = pnand %p682_p4, %p676_p5 }
  0x3c   : > { %686 = shalt.err (!%p683_p6)
}
  0x3d   : > { %s687_s7 = scalar_lea.vmem %s905_s22, 128  ;;  %s777_s18 = smov [#allocation2]  }
  0x3e   : > { %p688_p8 = scmp.ne.s32.totalorder %s905_s22, %s687_s7  ;;  %s692_s24 = sshll.u32 %s777_s18, 4  ;;  %s693_s24 = int_to_ptr.vmem [resolvable:$false] %s692_s24 }
  0x3f   : > { %s694_s25 = scalar_lea.vmem %s693_s24, 256  ;;  %p695_p3 = scmp.lt.s32.totalorder %s905_s22, %s693_s24 }
  0x40   : > { %p690_p10 = pnand %p688_p8, %p674_p0  ;;  %p696_p7 = scmp.lt.s32.totalorder %s694_s25, %s687_s7 }
  0x42   : > { %p691_p13 = pneg %p690_p10  ;;  %p697_p9 = por %p696_p7, %p695_p3 }
  0x44   : > { %p698_p2 = pnand %p697_p9, %p691_p13 }
  0x46   : > { %701 = shalt.err (!%p698_p2)
}
  0x47   : > { %591 = dma.hbm_to_vmem [thread:$0]  (!%p901_p11), %s899_s27, 128, %s905_s22, %s124_s28  }
  0x48   : > { %p1021_p5 = scmp.ne.s32.totalorder %s1016_s17, 0 }
  0x49   : > { %s935_s20 = sand.u32 (!%p1021_p5), 1, %s764_s10   ;;  %p1022_p0 = scmp.ne.s32.totalorder (!%p1021_p5), %s1014_s15, 0 }
  0x4a   : > { %143 = sbr.rel (%p1021_p5) target bundleno = 1178 (0x49a), region = 28  ;;  %s529_s26 = sshll.u32 (!%p1021_p5), %s935_s20, 3 }
  0x4b   : > { %s146_s19 = scalar_lea.sflag (!%p1021_p5), [#allocation3], %s935_s20  ;;  %s149_s29 = scalar_lea.vmem (!%p1021_p5), [#allocation2], %s529_s26 }
  0x51   : > { %747 = dma.done.wait (%p1022_p0), %s146_s19, 128  }
  0x52   : > { %749 = vsyncadd (%p1022_p0), %s146_s19, 4294967168  ;;  %p1023_p11 = scmp.eq.s32.totalorder %s820_s13, 0 }
  0x54   : > { %751 = dma.done.wait (%p1023_p11), [#allocation6], 512   ;;  %p1024_p1 = pmov %p1023_p11 }
  0x55   : > { %v778_v0 = vmov 0.0|0.0   ;;  %vm779_vm0 = vmmov 0   ;;  %v780_v1 = vmov 0.0   ;;  %v175_v2 = vld [vmem:[#allocation5] sm:$0xff]  ;;  %v176_v3 = vld [vmem:[#allocation5 + $0x8] sm:$0xff]  ;;  %v177_v4 = vld [vmem:[#allocation5 + $0x10] sm:$0xff]  ;;  %v253_v13 = vlaneseq }
  0x56   : > { %753 = vsyncadd (%p1024_p1), [#allocation6], 4294966784  ;;  %570 = vmatprep.subr.bf16.mxu0 %v778_v0  ;;  %557 = vmatprep.mubr.msk.f32.mxu0 %vm779_vm0, %v780_v1  ;;  %v571_v5 = vpack.c.bf16 %v176_v3, %v175_v2  ;;  %v178_v6 = vld [vmem:[#allocation5 + $0x18] sm:$0xff]  ;;  %vm179_vm1 = vcmask 261120   ;;  %s781_s15 = smov 112   ;;  %vm262_vm2 = vcmask 130048  }
  0x57   : > { %560 = vmatprep.subr.mxu1 %v780_v1  ;;  %562 = vmatprep.mubr.msk.f32.mxu1 %vm779_vm0, %v780_v1  ;;  %v574_v7 = vpack.c.bf16 %v178_v6, %v177_v4  ;;  %v174_v8 = vld [vmem:[%s149_s29] sm:$0xff]  ;;  %v254_v14 = vshrl.u32 %v253_v13, 7  ;;  %v256_v15 = vand.u32 127, %v253_v13  ;;  %vm339_vm4 = vcmask 64512   ;;  %s782_s17 = smov 96   ;;  %s537_s27 = sshll.u32 %s820_s13, 7 }
  0x58   : > { %572 = vmatpush3.bf16.msra.mxu0 %v571_v5  ;;  %s173_s22 = scalar_lea.vmem [#allocation7], %s529_s26  ;;  %s963_s3 = scalar_lea.hbm %s1010_s2, %s537_s27 }
  0x59   : > { %573 = vmatprep.subr.bf16.mxu0 %v778_v0  ;;  %vm257_vm3 = vcmp.le.s32.totalorder %v256_v15, %v254_v14  ;;  %s442_s23 = sshll.u32 %s173_s22, 4  ;;  %s429_s4 = scalar_lea.sflag [#allocation4], %s935_s20  ;;  %s965_s23 = int_to_ptr.vmem [resolvable:$true] %s442_s23 }
  0x5a   : > { %s702_s5 = scalar_lea.vmem %s965_s23, 128  ;;  %s783_s13 = smov [#allocation7]  }
  0x5b   : > { %p703_p4 = scmp.ne.s32.totalorder %s965_s23, %s702_s5  ;;  %s706_s6 = sshll.u32 %s783_s13, 4  ;;  %s707_s6 = int_to_ptr.vmem [resolvable:$false] %s706_s6 }
  0x5c   : > { %575 = vmatpush3.bf16.msra.mxu0 %v574_v7  ;;  %s708_s7 = scalar_lea.vmem %s707_s6, 256  ;;  %p709_p10 = scmp.lt.s32.totalorder %s965_s23, %s707_s6 }
  0x5d   : > { %p704_p6 = pnand %p703_p4, %p890_p12  ;;  %p710_p13 = scmp.lt.s32.totalorder %s708_s7, %s702_s5 }
  0x5f   : > { %558 = vmatmul.mubr.msk.f32.vlgmr.msra.gmra.mrb[0].mxu0 %vm179_vm1, %v174_v8  ;;  %p705_p8 = pneg %p704_p6  ;;  %p711_p3 = por %p710_p13, %p709_p10 }
  0x61   : > { %p712_p7 = pnand %p711_p3, %p705_p8 }
 0x132   : > { %v249_v9 = vpop.f32.mrb[0].mxu0 }
 0x133   : > { %260 = vrot.lane.b32.xlu0 %v249_v9, %s781_s15  ;;  %v559_v10 = vpop.f32.mrb[1].mxu0  ;;  %v258_v12 = vmul.f32 0.17677669, %v249_v9 }
 0x1a5   : > { %v261_v11 = vpop.permute.xlu0 %260 }
 0x1a6   : > { %561 = vmatpush3.xpose.msk.msra.mxu1 %vm262_vm2, %v261_v11 }
 0x1a7   : > { %565 = vmatprep.subr.mxu1 %v780_v1 }
 0x1a9   : > { %563 = vmatmul.mubr.msk.f32.vlgmr.msra.gmra.mrb[0].mxu1 %vm262_vm2, %v258_v12 }
 0x1aa   : > { %567 = vmatprep.mubr.msk.f32.mxu1 %vm779_vm0, %v780_v1 }
 0x27c   : > { %v334_v16 = vpop.f32.mrb[0].mxu1 }
 0x27d   : > { %v338_v17 = vsel %vm257_vm3, %v334_v16, -1e+30  ;;  %v564_v18 = vpop.f32.mrb[1].mxu1 }
 0x27e   : > { %v340_v19 = vsel %vm339_vm4, %v338_v17, -inf }
 0x27f   : > { %341 = vmax.xlane.f32.xlu0 %v340_v19 }
 0x30c   : > { %v342_v20 = vpop.xlane.xlu0 %341 }
 0x30d   : > { %v343_v21 = vsub.f32 %v338_v17, %v342_v20 }
 0x30f   : > { %v344_v22 = vmul.f32 1.442695, %v343_v21 }
 0x311   : > { %640 = vpow2.f32 %v344_v22 }
 0x31b   : > { %v641_v23 = vpop.eup %640 }
 0x31c   : > { %v346_v24 = vsel %vm339_vm4, %v641_v23, 0.0 }
 0x31d   : > { %347 = vadd.xlane.f32.xlu1 %v346_v24 }
 0x32e   : > { %351 = vrot.lane.b32.xlu1 %v249_v9, %s782_s17 }
 0x3aa   : > { %v348_v25 = vpop.xlane.xlu1 %347 }
 0x3ab   : > { %642 = vrcp.f32 %v348_v25 }
 0x3ae   : > { %v352_v26 = vpop.permute.xlu1 %351 }
 0x3af   : > { %566 = vmatpush3.msra.mxu1 %v352_v26 }
 0x3b5   : > { %v643_v27 = vpop.eup %642 }
 0x3b6   : > { %v350_v28 = vmul.f32 %v643_v27, %v641_v23 }
 0x3b8   : > { %568 = vmatmul.mubr.msk.f32.vlgmr.msra.gmra.mrb[2].mxu1 %vm339_vm4, %v350_v28 }
 0x48b   : > { %v423_v29 = vpop.f32.mrb[2].mxu1 }
 0x48c   : > { %427 = vst.msk [vmem:[%s173_s22] sm:$0xff] %vm262_vm2, %v423_v29  ;;  %v569_v30 = vpop.f32.mrb[3].mxu1 }
 0x48d   : > { %715 = shalt.err (!%p712_p7)
}
 0x48e   : > { %s716_s18 = scalar_lea.hbm %s963_s3, 128  ;;  %s720_s20 = scalar_lea.hbm %s1010_s2, 256 }
 0x48f   : > { %p717_p9 = scmp.ne.s32.totalorder %s963_s3, %s716_s18  ;;  %p721_p0 = scmp.lt.u32.totalorder %s963_s3, %s1010_s2 }
 0x490   : > { %p722_p11 = scmp.lt.u32.totalorder %s720_s20, %s716_s18  ;;  %p724_p4 = scmp.lt.u32.totalorder %s716_s18, %s963_s3 }
 0x491   : > { %p718_p2 = pnand %p717_p9, %p890_p12 }
 0x492   : > { %p723_p1 = por %p722_p11, %p721_p0 }
 0x493   : > { %p719_p5 = pneg %p718_p2 }
 0x494   : > { %p725_p6 = por %p724_p4, %p723_p1 }
 0x496   : > { %p726_p8 = pnand %p725_p6, %p719_p5 }
 0x498   : > { %729 = shalt.err (!%p726_p8)
}
 0x499   : > { %582 = dma.vmem_to_hbm [thread:$0]  (%p890_p12), %s965_s23, 128, %s963_s3, %s429_s4  }
 0x49a PF: > { %s454_s29 = sand.u32 1, %s760_s9   ;;  %p1025_p10 = scmp.ne.s32.totalorder %s1015_s16, 0 }
 0x49b   : > { %p1026_p13 = scmp.ge.s32.totalorder %s772_s12, 2  ;;  %s455_s15 = scalar_lea.sflag [#allocation4], %s454_s29 }
 0x49d   : > { %p593_p3 = pnand %p1026_p13, %p1025_p10 }
 0x49f   : > { %755 = dma.done.wait (!%p593_p3), %s455_s15, 128  }
 0x4a0   : > { %757 = vsyncadd (!%p593_p3), %s455_s15, 4294967168  ;;  %p16_p7 = scmp.ge.s32.totalorder %s855_s21, 4   ;;  %s1027_s9 = smov %s764_s10 }
 0x4a1   : > { %s1028_s10 = smov %s768_s11  ;;  %s1029_s11 = smov %s886_s8 }
 0x4a2   : > { %s1030_s12 = smov %s855_s21  ;;  %18 = sbr.rel (!%p16_p7) target bundleno = 6 (0x6), region = 77 }
 0x4a9   :  { %460 = vsyncpa [#allocation3], 1 }
 0x4aa   :  { %462 = vsyncpa [#allocation3 + $0x1], 1 }
 0x4ab   :  { %463 = vsyncpa [#allocation6], 1 }
 0x4ac   :  { %464 = vsyncpa [#allocation4], 1 }
 0x4ad   :  { %466 = vsyncpa [#allocation4 + $0x1], 1 }

</bundles_post_ra>
